<compile_context>
chip_gen: v5e
topology: v5e:2x2
jax: 0.10.0
libtpu: 0.0.40
codegen_flags: <defaults>
</compile_context>

<pallas_src>
import jax
import jax.numpy as jnp
from jax.experimental import pallas as pl
from jax.experimental.pallas import tpu as pltpu


# --------------------------------------------------------------------------- kernel

def _mixer_blend_kernel(perc_ref, pos_attn_ref, cont_attn_ref, attn_ref):
    """attn = cont + p * (pos - cont).  perc is (tb, 1) or (tb, W); broadcasting handles both."""
    cont = cont_attn_ref[...]
    attn_ref[...] = cont + perc_ref[...] * (pos_attn_ref[...] - cont)


# --------------------------------------------------------------------------- sizing helpers

def _vmem_budget_and_limit():
    """Per-generation (tile budget, vmem_limit_bytes).

    v7x has 64 MiB VMEM per TensorCore -> keep a ~40 MiB tile budget under a 48 MiB limit.
    v5e/v6e have 128 MiB -> go bigger (56 MiB budget / 64 MiB limit, lifting the small
    scoped default so the tile picker, not the limit, is the constraint).
    """
    cap = None
    try:
        cap = getattr(pltpu.get_tpu_info(), "vmem_capacity_bytes", None)
    except Exception:  # pragma: no cover - hardware query can fail off-device
        cap = None
    if cap is None:
        cap = 64 * 1024 * 1024  # conservative: assume v7x-class per-TC VMEM
    if cap <= 64 * 1024 * 1024:
        return 40 * 1024 * 1024, 48 * 1024 * 1024
    return 56 * 1024 * 1024, 64 * 1024 * 1024


def _pick_row_tile(n_rows, lane_width, itemsize, n_streams, budget_bytes):
    """Largest multiple-of-8 row tile whose double-buffered footprint fits the budget.

    Footprint ~ 2 (double buffer) * n_streams (big tiles) * tb * lane_width * itemsize.
    Never returns a ragged-on-purpose full-extent block for large arrays: a ragged LAST
    tile is handled by grid=cdiv(n_rows, tb) + masking, which keeps pipelining alive.
    """
    if n_rows <= 8:
        return n_rows  # full extent: legal block even when n_rows is not a multiple of 8
    per_row = 2 * n_streams * lane_width * itemsize
    tb = max(8, budget_bytes // max(per_row, 1))
    tb = min(tb, n_rows)
    tb = max(8, (tb // 8) * 8)
    return tb


def _pick_lane_width(total, cap_elems=8192):
    """Largest multiple-of-128 divisor of `total` (capped), or None if there is none."""
    best = None
    w = 128
    limit = min(total, cap_elems)
    while w <= limit:
        if total % w == 0:
            best = w
        w += 128
    return best


# --------------------------------------------------------------------------- wrapper

def attention_mixer(decoder_output, step, content_attn, content_confidence,
                    pos_attn, pos_confidence, position_perc_old,
                    *, mode="pos_conf", training=False, n_training_calls=0,
                    n_steps_wait=0, default_pos_perc=0.5,
                    row_tile=None, lane_width=None):
    """JAX/Pallas equivalent of AttentionMixer.forward (pure-tensor parts).

    Returns (attn, position_perc, additional) with additional['pos_perc'] matching the
    module's per-batch mean of position_perc.
    """
    del decoder_output, step, position_perc_old  # unused in 'pos_conf' / 'normalized_pos_conf'
    B, T, S = content_attn.shape
    N = B * T
    dtype = content_attn.dtype
    itemsize = jnp.dtype(dtype).itemsize

    # --- position percentage: only B*T scalars -> computed exactly in plain JAX (free).
    if training and n_training_calls < n_steps_wait:
        # waiting phase: constant positional percentage (shape (B,1), as in the module)
        position_perc = jnp.full((B, 1), default_pos_perc, dtype=dtype)
    elif mode == "pos_conf":
        position_perc = pos_confidence
    elif mode == "normalized_pos_conf":
        position_perc = pos_confidence / (pos_confidence + content_confidence)
    else:
        raise ValueError("Unknown mode={}".format(mode))
    # TODO(synk): rounder_perc / regularization-loss rescaling / add_to_test hooks omitted.

    perc_bt = jnp.broadcast_to(position_perc.reshape(B, -1), (B, T)).astype(dtype)

    budget, vmem_limit = _vmem_budget_and_limit()

    pos2 = pos_attn.reshape(N, S)
    cont2 = content_attn.reshape(N, S)

    if S % 128 == 0:
        # Already lane-dense: keep (N, S) rows, perc as a tiny (N, 1) per-row column.
        perc_in = perc_bt.reshape(N, 1)
        R, W = N, S
        n_streams = 3  # pos, cont, attn (perc column is negligible)
    else:
        # Re-pack the flat element stream to (R, W) with W a multiple of 128 so every
        # load/store is an unmasked full-lane access.  Packing mixes rows within a lane
        # row, so perc is pre-broadcast to full size in the wrapper.
        total = N * S
        W = lane_width if lane_width is not None else _pick_lane_width(total)
        if W is not None:
            R = total // W
            perc_in = jnp.broadcast_to(perc_bt[..., None], (B, T, S)).reshape(R, W)
            pos2 = pos2.reshape(R, W)
            cont2 = cont2.reshape(R, W)
            n_streams = 4  # perc, pos, cont, attn are all full-size streams
        else:
            # No multiple-of-128 factorization of N*S: lane-sparse but still correct.
            perc_in = perc_bt.reshape(N, 1)
            R, W = N, S
            n_streams = 3

    tb = row_tile if row_tile is not None else _pick_row_tile(R, W, itemsize, n_streams, budget)
    grid = (pl.cdiv(R, tb),)
    pw = perc_in.shape[1]

    cost = pl.CostEstimate(
        flops=3 * R * W,                                   # sub, mul, add per element
        transcendentals=0,
        bytes_accessed=(3 * R * W + R * pw) * itemsize,    # pos + cont + attn (+ perc)
    )

    attn2 = pl.pallas_call(
        _mixer_blend_kernel,
        out_shape=jax.ShapeDtypeStruct((R, W), dtype),
        grid=grid,
        in_specs=[
            pl.BlockSpec((tb, pw), lambda i: (i, 0)),      # position percentage
            pl.BlockSpec((tb, W), lambda i: (i, 0)),       # positional attention rows
            pl.BlockSpec((tb, W), lambda i: (i, 0)),       # content attention rows
        ],
        out_specs=pl.BlockSpec((tb, W), lambda i: (i, 0)),
        compiler_params=pltpu.CompilerParams(
            dimension_semantics=("parallel",),             # shard row tiles across TCs (v7x)
            vmem_limit_bytes=vmem_limit,
        ),
        cost_estimate=cost,
    )(perc_in, pos2, cont2)

    attn = attn2.reshape(B, T, S)

    # additional['pos_perc'] = per-batch mean of position_perc (tiny -> plain JAX).
    additional = {"pos_perc": jnp.mean(position_perc.reshape(B, -1), axis=-1).reshape(-1)}
    return attn, position_perc, additional


# --------------------------------------------------------------------------- demo / checks

if __name__ == "__main__":
    key = jax.random.PRNGKey(0)
    B, T, H = 2, 8, 32
    default_pos_perc = 0.5

    def make_inputs(S, k0):
        k = jax.random.split(k0, 5)
        decoder_output = jax.random.normal(k[0], (B, T, H), jnp.float32)
        content_attn = jax.nn.softmax(jax.random.normal(k[1], (B, T, S), jnp.float32), axis=-1)
        pos_attn = jax.nn.softmax(jax.random.normal(k[2], (B, T, S), jnp.float32), axis=-1)
        content_confidence = jax.nn.sigmoid(jax.random.normal(k[3], (B, T), jnp.float32))
        pos_confidence = jax.nn.sigmoid(jax.random.normal(k[4], (B, T), jnp.float32))
        position_perc_old = jnp.full((B, 1), default_pos_perc, jnp.float32)
        return (decoder_output, content_attn, pos_attn, content_confidence,
                pos_confidence, position_perc_old)

    def ref_forward(c_attn, c_conf, p_attn, p_conf, mode):
        if mode == "pos_conf":
            perc = p_conf
        else:
            perc = p_conf / (p_conf + c_conf)
        attn = p_attn * perc[..., None] + (1.0 - perc[..., None]) * c_attn
        return attn, perc

    # S=128 exercises the lane-dense column path (row_tile=8 -> grid of 2, pipelined);
    # S=16 exercises the row-packed lane-dense path (W chosen automatically).
    for S, row_tile in ((128, 8), (16, None)):
        dec, c_attn, p_attn, c_conf, p_conf, perc_old = make_inputs(S, jax.random.fold_in(key, S))
        for mode in ("pos_conf", "normalized_pos_conf"):
            attn, perc, add = attention_mixer(
                dec, 0, c_attn, c_conf, p_attn, p_conf, perc_old,
                mode=mode, training=False, default_pos_perc=default_pos_perc,
                row_tile=row_tile)
            jax.block_until_ready((attn, perc, add["pos_perc"]))

            ref_attn, ref_perc = ref_forward(c_attn, c_conf, p_attn, p_conf, mode)
            assert attn.shape == (B, T, S) and perc.shape == (B, T)
            assert jnp.allclose(attn, ref_attn, atol=1e-6, rtol=1e-6)
            assert jnp.allclose(perc, ref_perc, atol=1e-6, rtol=1e-6)
            assert jnp.allclose(add["pos_perc"], jnp.mean(ref_perc, axis=-1), atol=1e-6)

    # Training waiting phase: constant default positional percentage (shape (B, 1)).
    dec, c_attn, p_attn, c_conf, p_conf, perc_old = make_inputs(128, jax.random.fold_in(key, 3))
    attn_w, perc_w, add_w = attention_mixer(
        dec, 0, c_attn, c_conf, p_attn, p_conf, perc_old,
        mode="pos_conf", training=True, n_training_calls=0, n_steps_wait=5,
        default_pos_perc=default_pos_perc)
    jax.block_until_ready((attn_w, perc_w, add_w["pos_perc"]))
    ref_attn_w = 0.5 * p_attn + 0.5 * c_attn
    assert perc_w.shape == (B, 1)
    assert jnp.allclose(attn_w, ref_attn_w, atol=1e-6, rtol=1e-6)
    assert jnp.allclose(perc_w, jnp.full((B, 1), default_pos_perc, jnp.float32), atol=1e-6)
    assert jnp.allclose(add_w["pos_perc"], jnp.full((B,), default_pos_perc), atol=1e-6)

    print("KERNEL_OK")
</pallas_src>

<mosaic_0001>
module attributes {stable_mosaic.version = 11 : i64} {
  func.func @_mixer_blend_kernel(%arg0: i32, %arg1: memref<8x1xf32, #tpu.memory_space<vmem>>, %arg2: memref<8x128xf32, #tpu.memory_space<vmem>>, %arg3: memref<8x128xf32, #tpu.memory_space<vmem>>, %arg4: memref<8x128xf32, #tpu.memory_space<vmem>>) attributes {dimension_semantics = [#tpu.dimension_semantics<parallel>], iteration_bounds = array<i64: 2>, scalar_prefetch = 0 : i64, scratch_operands = 0 : i64, tpu.core_type = #tpu.core_type<tc>, window_params = [{transform_indices = @transform_0, window_bounds = array<i64: 8, 1>}, {transform_indices = @transform_1, window_bounds = array<i64: 8, 128>}, {transform_indices = @transform_2, window_bounds = array<i64: 8, 128>}, {transform_indices = @transform_3, window_bounds = array<i64: 8, 128>}]} {
    %c0 = arith.constant 0 : index
    %c0_0 = arith.constant 0 : index
    %0 = vector.load %arg3[%c0, %c0_0] : memref<8x128xf32, #tpu.memory_space<vmem>>, vector<8x128xf32>
    %c0_1 = arith.constant 0 : index
    %c0_2 = arith.constant 0 : index
    %1 = vector.load %arg1[%c0_1, %c0_2] : memref<8x1xf32, #tpu.memory_space<vmem>>, vector<8x1xf32>
    %c0_3 = arith.constant 0 : index
    %c0_4 = arith.constant 0 : index
    %2 = vector.load %arg2[%c0_3, %c0_4] : memref<8x128xf32, #tpu.memory_space<vmem>>, vector<8x128xf32>
    %3 = arith.subf %2, %0 : vector<8x128xf32>
    %4 = vector.broadcast %1 : vector<8x1xf32> to vector<8x128xf32>
    %5 = arith.mulf %4, %3 : vector<8x128xf32>
    %6 = arith.addf %0, %5 : vector<8x128xf32>
    %c0_5 = arith.constant 0 : index
    %c0_6 = arith.constant 0 : index
    %7 = vector.load %arg4[%c0_5, %c0_6] : memref<8x128xf32, #tpu.memory_space<vmem>>, vector<8x128xf32>
    tpu.vector_store %arg4[%c0_5, %c0_6], %6 {strides = array<i32>} : memref<8x128xf32, #tpu.memory_space<vmem>>, vector<8x128xf32>,
    return
  }
  func.func @transform_0(%arg0: i32) -> (i32, i32) {
    %c0_i32 = arith.constant 0 : i32
    %c0_i32_0 = arith.constant 0 : i32
    return %arg0, %c0_i32 : i32, i32
  }
  func.func @transform_1(%arg0: i32) -> (i32, i32) {
    %c0_i32 = arith.constant 0 : i32
    %c0_i32_0 = arith.constant 0 : i32
    return %arg0, %c0_i32 : i32, i32
  }
  func.func @transform_2(%arg0: i32) -> (i32, i32) {
    %c0_i32 = arith.constant 0 : i32
    %c0_i32_0 = arith.constant 0 : i32
    return %arg0, %c0_i32 : i32, i32
  }
  func.func @transform_3(%arg0: i32) -> (i32, i32) {
    %c0_i32 = arith.constant 0 : i32
    %c0_i32_0 = arith.constant 0 : i32
    return %arg0, %c0_i32 : i32, i32
  }
}

</mosaic_0001>

<bundles_post_ra>
// kernel: tpu_custom_call.1
= control target key start
LH: loop header
LB: loop body
LE: loop exit
PB: predicated region body
PF: predicated region fallthrough
CT: control target
= control target key end

     0   :  { %8 = vsyncpa [#allocation3], 0  ;;  %s660_s0 = inlined_call_operand.vmem [shape: f32[16,1], index: 0, kind: input, shape index: {}]   ;;  %s661_s1 = inlined_call_operand.vmem [shape: f32[16,128], index: 1, kind: input, shape index: {}]   ;;  %s662_s2 = inlined_call_operand.hbm [shape: f32[16,128], index: 2, kind: input, shape index: {}]   ;;  %s663_s3 = inlined_call_operand.hbm [shape: f32[16,128], index: 3, kind: output, shape index: {}]  }
   0x1   :  { %10 = vsyncpa [#allocation3 + $0x1], 0 }
   0x2   :  { %11 = vsyncpa [#allocation4], 0 }
   0x3   :  { %13 = vsyncpa [#allocation4 + $0x1], 0  ;;  %s525_s12 = smov 0   ;;  %s527_s13 = smov 0  }
   0x4   :  { %s529_s14 = smov 0   ;;  %s531_s15 = smov 0  }
   0x5 LB: > { %s546_s16 = sadd.s32 4294967295, %s502_s15   ;;  %s344_s17 = sadd.s32 4294967294, %s502_s15   ;;  %s502_s15 = sphi %s531_s15, %s673_s15   ;;  %s498_s14 = sphi %s529_s14, %s672_s14   ;;  %s494_s13 = sphi %s527_s13, %s671_s13   ;;  %s490_s12 = sphi %s525_s12, %s670_s12  }
   0x6   : > { %s550_s18 = sadd.s32 1, %s502_s15   ;;  %s78_s19 = sadd.s32 1, %s498_s14 }
   0x7   : > { %s75_s20 = ssub.s32 %s502_s15, %s550_s18  ;;  %p85_p0 = scmp.ne.s32.totalorder %s498_s14, %s494_s13 }
   0x8   : > { %p76_p1 = scmp.eq.s32.totalorder %s75_s20, 0  ;;  %p86_p2 = scmp.eq.s32.totalorder %s502_s15, 0 }
   0x9   : > { %p91_p3 = scmp.ne.s32.totalorder %s494_s13, %s490_s12  ;;  %p92_p4 = scmp.eq.s32.totalorder %s546_s16, 0 }
   0xa   : > { %s562_s21 = scalar_select %p76_p1, %s498_s14, %s78_s19  }
   0xb   : > { %p564_p5 = por %p86_p2, %p85_p0  ;;  %p568_p6 = por %p92_p4, %p91_p3 }
   0xc   : > { %p115_p7 = scmp.eq.s32.totalorder %s546_s16, 1  ;;  %p121_p8 = scmp.eq.s32.totalorder %s344_s17, 1 }
   0xd   : > { %p370_p10 = scmp.lt.s32.totalorder %s502_s15, 2  ;;  %s155_s26 = sand.u32 1, %s498_s14  }
   0xe   : > { %p575_p11 = por %p115_p7, %p85_p0  ;;  %p579_p12 = por %p121_p8, %p91_p3 }
   0xf   : > { %s348_s27 = sshll.u32 %s502_s15, 3  ;;  %s347_s28 = sshll.u32 %s155_s26, 3 }
  0x10   : > { %s163_s4 = scalar_lea.hbm %s662_s2, %s348_s27  ;;  %s159_s6 = scalar_lea.vmem [#allocation2], %s347_s28 }
  0x11   : > { %s165_s5 = sshll.u32 %s163_s4, 4  ;;  %s167_s7 = sshll.u32 %s159_s6, 4  ;;  %s166_s5 = int_to_ptr.hbm [resolvable:$true] %s165_s5  ;;  %s168_s7 = int_to_ptr.vmem [resolvable:$true] %s167_s7 }
  0x12   : > { %p590_p13 = pnand %p370_p10, %p564_p5  ;;  %p349_p0 = scmp.ge.s32.totalorder %s502_s15, 1 }
  0x13   : > { %p172_p1 = scmp.lt.s32.totalorder %s502_s15, 3  ;;  %s156_s9 = scalar_lea.sflag [#allocation3], %s155_s26 }
  0x14   : > { %s406_s10 = sshra.s32 %s166_s5, 4  ;;  %p410_p3 = pneg %p590_p13  ;;  %s407_s10 = int_to_ptr.hbm [resolvable:$true] %s406_s10 }
  0x15   : > { %s408_s11 = scalar_lea.hbm %s407_s10, 8  ;;  %s413_s20 = scalar_lea.hbm %s662_s2, 16 }
  0x16   : > { %p409_p2 = scmp.ne.s32.totalorder %s407_s10, %s408_s11  ;;  %p414_p5 = scmp.lt.s32.totalorder %s407_s10, %s662_s2 }
  0x17   : > { %p415_p8 = scmp.lt.s32.totalorder %s413_s20, %s408_s11 }
  0x18   : > { %p411_p4 = pnand %p410_p3, %p409_p2 }
  0x19   : > { %p416_p10 = por %p415_p8, %p414_p5 }
  0x1a   : > { %p412_p7 = pneg %p411_p4 }
  0x1c   : > { %p417_p9 = pnand %p416_p10, %p412_p7 }
  0x1e   : > { %420 = shalt.err (!%p417_p9)
}
  0x1f   : > { %365 = dma.hbm_to_vmem [thread:$0]  (!%p590_p13), %s166_s5, 128, %s168_s7, %s156_s9  }
  0x20   : > { %p173_p2 = pnand %p349_p0, %p172_p1 }
  0x21   : > { %s611_s26 = sand.u32 (!%p173_p2), 1, %s494_s13  }
  0x22   : > { %176 = sbr.rel (%p173_p2) target bundleno = 169 (0xa9), region = 32  ;;  %s350_s28 = sshll.u32 (!%p173_p2), %s611_s26, 3 }
  0x23   : > { %s179_s29 = scalar_lea.sflag (!%p173_p2), [#allocation3], %s611_s26  ;;  %s182_s30 = scalar_lea.vmem (!%p173_p2), [#allocation2], %s350_s28 }
  0x27   : > { %481 = dma.done.wait (%p568_p6), %s179_s29, 128  }
  0x28   : > { %483 = vsyncadd (%p568_p6), %s179_s29, 4294967168  ;;  %p214_p9 = scmp.lt.s32.totalorder %s546_s16, 1  ;;  %v504_v0 = vmov 0   ;;  %v222_v3 = vld [vmem:[%s182_s30] sm:$0xff]  ;;  %s355_s11 = sshll.u32 %s546_s16, 3 }
  0x29   : > { %405 = vset.pattern.permute.xlu0 %v504_v0  ;;  %s245_s20 = scalar_lea.hbm %s663_s3, %s355_s11  ;;  %s213_s22 = scalar_lea.vmem [#allocation5], %s350_s28 }
  0x2a   : > { %s215_s4 = scalar_select %p214_p9, %s546_s16, 1 }
  0x2b   : > { %s247_s27 = sshll.u32 %s213_s22, 4  ;;  %s249_s29 = sshll.u32 %s245_s20, 4  ;;  %s248_s27 = int_to_ptr.vmem [resolvable:$true] %s247_s27  ;;  %s250_s29 = int_to_ptr.hbm [resolvable:$true] %s249_s29 }
  0x2c   : > { %s352_s5 = sshll.u32 %s215_s4, 3  ;;  %s235_s4 = scalar_lea.sflag [#allocation4], %s611_s26 }
  0x2d   : > { %s217_s8 = scalar_lea.vmem %s660_s0, %s352_s5  ;;  %s221_s23 = scalar_lea.vmem %s661_s1, %s352_s5 }
  0x2e   : > { %v223_v1 = vld [vmem:[%s217_s8] sm:$0xff]  ;;  %s450_s5 = sshra.s32 %s250_s29, 4  ;;  %s456_s7 = scalar_lea.hbm %s663_s3, 16  ;;  %s451_s5 = int_to_ptr.hbm [resolvable:$true] %s450_s5 }
  0x2f   : > { %228 = vperm.xlu0 %405, %v223_v1   ;;  %v224_v2 = vld [vmem:[%s221_s23] sm:$0xff]  ;;  %s452_s30 = scalar_lea.hbm %s451_s5, 8  ;;  %p457_p1 = scmp.lt.s32.totalorder %s451_s5, %s663_s3 }
  0x30   : > { %v225_v4 = vsub.f32 %v224_v2, %v222_v3  ;;  %p453_p6 = scmp.ne.s32.totalorder %s451_s5, %s452_s30  ;;  %p458_p3 = scmp.lt.s32.totalorder %s456_s7, %s452_s30 }
  0x32   : > { %p454_p13 = pnand %p453_p6, %p575_p11  ;;  %p459_p4 = por %p458_p3, %p457_p1 }
  0x34   : > { %p455_p0 = pneg %p454_p13 }
  0x36   : > { %p460_p7 = pnand %p459_p4, %p455_p0 }
  0xa1   : > { %v229_v5 = vpop.permute.xlu0 %228 }
  0xa2   : > { %v231_v6 = vmul.f32 %v229_v5, %v225_v4 }
  0xa4   : > { %v232_v7 = vadd.f32 %v231_v6, %v222_v3 }
  0xa6   : > { %233 = vst [vmem:[%s213_s22] sm:$0xff] %v232_v7 }
  0xa7   : > { %463 = shalt.err (!%p460_p7)
}
  0xa8   : > { %360 = dma.vmem_to_hbm [thread:$0]  (%p575_p11), %s248_s27, 128, %s250_s29, %s235_s4  }
  0xa9 PF: > { %s261_s26 = sand.u32 1, %s490_s12   ;;  %p669_p5 = scmp.ge.s32.totalorder %s502_s15, 2 }
  0xaa   : > { %s262_s9 = scalar_lea.sflag [#allocation4], %s261_s26 }
  0xab   : > { %p367_p8 = pnand %p669_p5, %p579_p12 }
  0xad   : > { %p368_p10 = pneg %p367_p8 }
  0xaf   : > { %485 = dma.done.wait (%p368_p10), %s262_s9, 128  }
  0xb0   : > { %487 = vsyncadd (%p368_p10), %s262_s9, 4294967168  ;;  %p16_p2 = scmp.ge.s32.totalorder %s550_s18, 4   ;;  %s670_s12 = smov %s494_s13 }
  0xb1   : > { %s671_s13 = smov %s498_s14  ;;  %s672_s14 = smov %s562_s21 }
  0xb2   : > { %s673_s15 = smov %s550_s18  ;;  %18 = sbr.rel (!%p16_p2) target bundleno = 5 (0x5), region = 83 }
  0xb7   :  { %268 = vsyncpa [#allocation3], 1 }
  0xb8   :  { %270 = vsyncpa [#allocation3 + $0x1], 1 }
  0xb9   :  { %271 = vsyncpa [#allocation4], 1 }
  0xba   :  { %273 = vsyncpa [#allocation4 + $0x1], 1 }

</bundles_post_ra>
